<compile_context>
chip_gen: v7x
topology: tpu7x:2x2x1
jax: 0.10.0
libtpu: 0.0.40
codegen_flags: <defaults>
</compile_context>

<pallas_src>
import functools

import jax
import jax.numpy as jnp
from jax.experimental import pallas as pl
from jax.experimental.pallas import tpu as pltpu


def edge_conv_kernel(xall_ref, xallT_ref, xq_ref, w1c_ref, w1n_ref, b1_ref,
                     w2_ref, b2_ref, o_ref, h_scr, *maybe_minval,
                     k, r, mxu_dtype):
    minval_scr = maybe_minval[0] if r is not None else None

    xall = xall_ref[0]                                  # (N, C)  all points
    xallT = xallT_ref[0]                                # (C, N)  pre-transposed
    xq = xq_ref[0]                                      # (TM, C) query rows
    N = xall.shape[0]
    TM = xq.shape[0]
    H = w1c_ref.shape[-1]
    Cout = w2_ref.shape[-1]

    # ---- pairwise squared distances, f32, lane-major (TM, N) --------------
    # sq_all is produced directly as a (1, N) row (sublane reduce over C) and
    # the distance matmul contracts against xallT, so no in-kernel transpose.
    sq_all = jnp.sum(xallT * xallT, axis=0, keepdims=True)          # (1, N)
    sq_q = jnp.sum(xq * xq, axis=-1, keepdims=True)                 # (TM, 1)
    dist = sq_q + sq_all - 2.0 * jnp.dot(
        xq, xallT, preferred_element_type=jnp.float32)              # (TM, N)

    # ---- loop-invariant MLP pieces, hoisted out of the k-loop -------------
    # First conv layer split into center/neighbor halves:
    #   relu(x_i @ w1c + x_j @ w1n + b1); the center half (+ bias) is
    #   invariant per query row, the neighbor half is precomputed per point.
    center_term = jnp.dot(
        xq, w1c_ref[...], preferred_element_type=jnp.float32) + b1_ref[...]
    xw1n = jnp.dot(
        xall, w1n_ref[...],
        preferred_element_type=jnp.float32).astype(mxu_dtype)       # (N, H)

    # ---- packed keys for the fused (value, index) argmin ------------------
    # Column index lives in the low mantissa bits; the +1.0 shift keeps every
    # key a normal positive float so float ordering == bit ordering, and ties
    # break toward the smallest index.
    # TODO(synk): for N >= 4096 fewer than ~12 mantissa bits remain, so
    #             near-tie neighbors may differ from the exact top-k.
    nbits = max((N - 1).bit_length(), 1)
    keep_mask = jnp.int32(~((1 << nbits) - 1))
    col = jax.lax.broadcasted_iota(jnp.int32, (TM, N), 1)
    d_shift = jnp.maximum(dist, 0.0) + 1.0
    keys0 = pltpu.bitcast(
        (pltpu.bitcast(d_shift, jnp.int32) & keep_mask) | col, jnp.float32)

    # ---- fused k-NN select + gather-as-matmul ------------------------------
    # Each slot: one cross-lane min (XLU), one compare/select (VPU), then the
    # (TM, N) one-hot goes straight into the MXU against xw1n; only a
    # (k, TM, H) hidden scratch is kept.
    def select_body(i, keys):
        kmin = jnp.min(keys, axis=-1, keepdims=True)   # one fused reduction
        onehot = keys == kmin                          # exactly one hit / row
        h_scr[i] = jnp.dot(onehot.astype(mxu_dtype), xw1n,
                           preferred_element_type=jnp.float32)       # (TM, H)
        if r is not None:
            # Exact selected distance (masked row-sum of the f32 distances)
            # so the r-radius mask matches the reference, untruncated.
            minval_scr[i] = jnp.sum(jnp.where(onehot, dist, 0.0),
                                    axis=-1, keepdims=True)
        return jnp.where(onehot, jnp.float32(jnp.inf), keys)

    jax.lax.fori_loop(0, k, select_body, keys0, unroll=min(k, 4))

    # ---- epilogue: ReLU + second 1x1 conv + r-mask + max over k slots ------
    h = jnp.maximum(h_scr[...] + center_term[None], 0.0)            # (k,TM,H)
    out = jnp.dot(h.reshape(k * TM, H).astype(mxu_dtype),
                  w2_ref[...].astype(mxu_dtype),
                  preferred_element_type=jnp.float32)                # (k*TM,Cout)
    out = out.reshape(k, TM, Cout) + b2_ref[...]

    if r is not None:                                   # max_pooling_with_r
        out = out + jnp.where(minval_scr[...] > jnp.float32(r),
                              jnp.float32(-1e8), jnp.float32(0.0))

    o_ref[0] = jnp.max(out, axis=0).astype(o_ref.dtype)


def _auto_row_tile(N):
    if N <= 512:
        return N
    for tm in (512, 256, 128, 64, 32, 16, 8):
        if N % tm == 0:
            return tm
    return N


def _lane_pad(n):
    return max(128, -(-n // 128) * 128)


def _vmem_estimate_bytes(N, C, TM, H, Cout, k, r, mxu_bytes):
    Nl, Hl, Cl, Ol = _lane_pad(N), _lane_pad(H), _lane_pad(C), _lane_pad(Cout)
    est = 0
    est += 2 * TM * Nl * 4                      # dist + keys carry
    est += TM * Nl * (4 + mxu_bytes)            # transient one-hot (+ cast)
    est += N * Hl * mxu_bytes                   # xw1n
    est += k * TM * Hl * 4                      # hidden (k, TM, H) scratch
    if r is not None:
        est += k * TM * 128 * 4                 # selected-distance scratch
    est += 2 * 4 * (N * Cl + 8 * Nl + TM * Cl)  # double-buffered input blocks
    est += 2 * TM * Ol * 4                      # output block
    return est


def edge_conv(x, w1t, b1, w2t, b2, *, k, r=None, relative_pos=False,
              row_tile=None, mxu_dtype=jnp.bfloat16, vmem_limit_bytes=None):
    """EdgeConv forward. w1t:(2C,H), b1:(1,H), w2t:(H,Cout), b2:(1,Cout)."""
    B, N, C = x.shape
    twoC, H = w1t.shape
    assert twoC == 2 * C, (w1t.shape, C)
    Cout = w2t.shape[-1]
    # Guard: k > N would make the one-hot selection degenerate (all-inf keys).
    assert 1 <= k <= N, (k, N)

    TM = _auto_row_tile(N) if row_tile is None else int(row_tile)
    assert N % TM == 0 and (TM == N or TM % 8 == 0), (N, TM)
    num_tiles = N // TM

    # Split first 1x1 conv into center/neighbor halves; the (linear)
    # relative-position shift on the neighbor xyz channels folds into the
    # center half, so no concat/slice is needed inside the kernel.
    w1c, w1n = w1t[:C], w1t[C:]
    if relative_pos and C == 6:
        w1c = w1c.at[:3].add(-w1n[:3])

    # Wrapper-side transpose so the kernel never relayouts (N,C)->(C,N).
    x_t = jnp.swapaxes(x, 1, 2)                  # (B, C, N)

    kernel = functools.partial(edge_conv_kernel, k=k, r=r, mxu_dtype=mxu_dtype)

    mxu_bytes = jnp.dtype(mxu_dtype).itemsize
    if vmem_limit_bytes is None:
        est = _vmem_estimate_bytes(N, C, TM, H, Cout, k, r, mxu_bytes)
        if est > 12 * 1024 * 1024:   # likely to exceed the smallest scoped default
            try:
                cap = int(pltpu.get_tpu_info().vmem_capacity_bytes)
            except Exception:
                cap = 64 * 1024 * 1024           # conservative (v7x per-TC)
            vmem_limit_bytes = int(min(int(0.9 * cap),
                                       max(32 * 1024 * 1024, 2 * est)))

    flops = B * (2 * N * N * C                       # pairwise distances
                 + 2 * k * N * N * H                 # fused gather-as-matmul
                 + 2 * k * N * H * Cout              # second conv layer
                 + 2 * N * C * H * (num_tiles + 1))  # hoisted layer-1 halves
    bytes_accessed = 4 * (B * N * C * (2 * num_tiles + 1) + B * N * Cout
                          + 2 * C * H + H + H * Cout + Cout)
    cost = pl.CostEstimate(flops=int(flops), transcendentals=0,
                           bytes_accessed=int(bytes_accessed))

    cparams = dict(dimension_semantics=("parallel", "parallel"))
    if vmem_limit_bytes is not None:
        cparams["vmem_limit_bytes"] = int(vmem_limit_bytes)

    scratch_shapes = [pltpu.VMEM((k, TM, H), jnp.float32)]   # hidden per slot
    if r is not None:
        scratch_shapes.append(pltpu.VMEM((k, TM, 1), jnp.float32))

    return pl.pallas_call(
        kernel,
        out_shape=jax.ShapeDtypeStruct((B, N, Cout), x.dtype),
        grid=(B, num_tiles),
        in_specs=[
            pl.BlockSpec((1, N, C), lambda b, i: (b, 0, 0)),    # all points
            pl.BlockSpec((1, C, N), lambda b, i: (b, 0, 0)),    # pre-transposed
            pl.BlockSpec((1, TM, C), lambda b, i: (b, i, 0)),   # query rows
            pl.BlockSpec((C, H), lambda b, i: (0, 0)),          # w1 center half
            pl.BlockSpec((C, H), lambda b, i: (0, 0)),          # w1 neighbor half
            pl.BlockSpec((1, H), lambda b, i: (0, 0)),
            pl.BlockSpec((H, Cout), lambda b, i: (0, 0)),
            pl.BlockSpec((1, Cout), lambda b, i: (0, 0)),
        ],
        out_specs=pl.BlockSpec((1, TM, Cout), lambda b, i: (b, i, 0)),
        scratch_shapes=scratch_shapes,
        compiler_params=pltpu.CompilerParams(**cparams),
        cost_estimate=cost,
    )(x, x_t, x, w1c, w1n, b1, w2t, b2)


def fold_bn(w, b, gamma, beta, mean, var, eps=1e-5):
    """Fold eval-mode BatchNorm into a 1x1 conv: returns (W_T, b) for x @ W_T + b."""
    scale = gamma / jnp.sqrt(var + eps)
    w_f = w * scale[:, None]                  # (out, in)
    b_f = (b - mean) * scale + beta           # (out,)
    return w_f.T, b_f[None, :]


def edge_conv_ref(x, w1t, b1, w2t, b2, k, r=None, relative_pos=False):
    """Pure-JAX reference mirroring the PyTorch forward (eval-mode BN)."""
    diff = x[:, :, None, :] - x[:, None, :, :]
    dist = jnp.sum(diff ** 2, axis=-1)                        # (B, N, N)
    neg_d, idx = jax.lax.top_k(-dist, k)                      # smallest k
    nearest_dist = -neg_d                                     # (B, N, k)
    gathered = jax.vmap(lambda xb, ib: xb[ib])(x, idx)        # (B, N, k, C)
    center = jnp.broadcast_to(x[:, :, None, :], gathered.shape)
    if relative_pos and x.shape[-1] == 6:
        gathered = jnp.concatenate(
            [gathered[..., :3] - center[..., :3], gathered[..., 3:]], axis=-1)
    edge = jnp.concatenate([center, gathered], axis=-1)       # (B, N, k, 2C)
    h = jnp.maximum(edge @ w1t + b1[0], 0.0)
    out = h @ w2t + b2[0]                                     # (B, N, k, Cout)
    if r is not None:
        out = out + jnp.where(nearest_dist > r, -1e8, 0.0)[..., None]
    return jnp.max(out, axis=2)


def make_params(key, C, Cout):
    """Random Conv+BN parameters (eval-mode) folded into (w1t, b1, w2t, b2)."""
    H = (2 * C) // 2
    ks = jax.random.split(key, 10)
    w1 = jax.random.normal(ks[0], (H, 2 * C), jnp.float32) * 0.2
    bias1 = jax.random.normal(ks[1], (H,), jnp.float32) * 0.1
    g1 = 1.0 + 0.1 * jax.random.normal(ks[2], (H,), jnp.float32)
    be1 = 0.1 * jax.random.normal(ks[3], (H,), jnp.float32)
    m1 = 0.05 * jax.random.normal(ks[4], (H,), jnp.float32)
    v1 = 0.5 + jnp.abs(jax.random.normal(ks[5], (H,), jnp.float32))
    w2 = jax.random.normal(ks[6], (Cout, H), jnp.float32) * 0.2
    bias2 = jax.random.normal(ks[7], (Cout,), jnp.float32) * 0.1
    g2 = 1.0 + 0.1 * jax.random.normal(ks[8], (Cout,), jnp.float32)
    be2 = 0.1 * jax.random.normal(ks[9], (Cout,), jnp.float32)
    m2 = jnp.zeros((Cout,), jnp.float32)
    v2 = jnp.ones((Cout,), jnp.float32)
    w1t, b1 = fold_bn(w1, bias1, g1, be1, m1, v1)      # (2C, H), (1, H)
    w2t, b2 = fold_bn(w2, bias2, g2, be2, m2, v2)      # (H, Cout), (1, Cout)
    return w1t, b1, w2t, b2


if __name__ == "__main__":
    B, N, k = 2, 16, 4
    key = jax.random.PRNGKey(0)
    kx, kp, kx6, kp6 = jax.random.split(key, 4)

    # ---- case 1: C=4, row-tiled grid, f32 MXU path ------------------------
    C, Cout = 4, 8
    x = jax.random.normal(kx, (B, N, C), jnp.float32)
    w1t, b1, w2t, b2 = make_params(kp, C, Cout)

    out = jax.block_until_ready(
        edge_conv(x, w1t, b1, w2t, b2, k=k, row_tile=8,
                  mxu_dtype=jnp.float32))
    ref = edge_conv_ref(x, w1t, b1, w2t, b2, k=k)
    assert out.shape == (B, N, Cout), out.shape
    assert jnp.allclose(out, ref, rtol=1e-4, atol=1e-4), (
        "f32 mismatch: %g" % float(jnp.max(jnp.abs(out - ref))))

    # ---- case 2: radius-masked max pooling (r != None), f32 ---------------
    out_r = jax.block_until_ready(
        edge_conv(x, w1t, b1, w2t, b2, k=k, r=4.0, row_tile=8,
                  mxu_dtype=jnp.float32))
    ref_r = edge_conv_ref(x, w1t, b1, w2t, b2, k=k, r=4.0)
    assert jnp.allclose(out_r, ref_r, rtol=1e-4, atol=1e-4), (
        "r-mask mismatch: %g" % float(jnp.max(jnp.abs(out_r - ref_r))))

    # ---- case 3: default bf16 MXU path (f32 distances / accumulation) -----
    out_bf = jax.block_until_ready(
        edge_conv(x, w1t, b1, w2t, b2, k=k, row_tile=8))
    assert jnp.allclose(out_bf, ref, rtol=5e-2, atol=5e-2), (
        "bf16 mismatch: %g" % float(jnp.max(jnp.abs(out_bf - ref))))

    # ---- case 4: relative_pos path (C == 6), single full-row tile, f32 ----
    C6, Cout6 = 6, 8
    x6 = jax.random.normal(kx6, (B, N, C6), jnp.float32)
    w1t6, b16, w2t6, b26 = make_params(kp6, C6, Cout6)
    out6 = jax.block_until_ready(
        edge_conv(x6, w1t6, b16, w2t6, b26, k=k, relative_pos=True,
                  mxu_dtype=jnp.float32))
    ref6 = edge_conv_ref(x6, w1t6, b16, w2t6, b26, k=k, relative_pos=True)
    assert jnp.allclose(out6, ref6, rtol=1e-4, atol=1e-4), (
        "relative_pos mismatch: %g" % float(jnp.max(jnp.abs(out6 - ref6))))

    print("KERNEL_OK")
</pallas_src>

<mosaic_0001>
module attributes {stable_mosaic.version = 11 : i64} {
  func.func @edge_conv_kernel(%arg0: i32, %arg1: i32, %arg2: memref<1x16x4xf32, #tpu.memory_space<vmem>>, %arg3: memref<1x4x16xf32, #tpu.memory_space<vmem>>, %arg4: memref<1x8x4xf32, #tpu.memory_space<vmem>>, %arg5: memref<4x4xf32, #tpu.memory_space<vmem>>, %arg6: memref<4x4xf32, #tpu.memory_space<vmem>>, %arg7: memref<1x4xf32, #tpu.memory_space<vmem>>, %arg8: memref<4x8xf32, #tpu.memory_space<vmem>>, %arg9: memref<1x8xf32, #tpu.memory_space<vmem>>, %arg10: memref<1x8x8xf32, #tpu.memory_space<vmem>>, %arg11: memref<4x8x4xf32, #tpu.memory_space<vmem>>) attributes {dimension_semantics = [#tpu.dimension_semantics<parallel>, #tpu.dimension_semantics<parallel>], iteration_bounds = array<i64: 2, 2>, scalar_prefetch = 0 : i64, scratch_operands = 1 : i64, tpu.core_type = #tpu.core_type<tc>, window_params = [{transform_indices = @transform_0, window_bounds = array<i64: 1, 16, 4>}, {transform_indices = @transform_1, window_bounds = array<i64: 1, 4, 16>}, {transform_indices = @transform_2, window_bounds = array<i64: 1, 8, 4>}, {pipeline_mode = #tpu.pipeline_mode<synchronous>, transform_indices = @transform_3, window_bounds = array<i64: 4, 4>}, {pipeline_mode = #tpu.pipeline_mode<synchronous>, transform_indices = @transform_4, window_bounds = array<i64: 4, 4>}, {pipeline_mode = #tpu.pipeline_mode<synchronous>, transform_indices = @transform_5, window_bounds = array<i64: 1, 4>}, {pipeline_mode = #tpu.pipeline_mode<synchronous>, transform_indices = @transform_6, window_bounds = array<i64: 4, 8>}, {pipeline_mode = #tpu.pipeline_mode<synchronous>, transform_indices = @transform_7, window_bounds = array<i64: 1, 8>}, {transform_indices = @transform_8, window_bounds = array<i64: 1, 8, 8>}]} {
    %c0 = arith.constant 0 : index
    %c0_0 = arith.constant 0 : index
    %c0_1 = arith.constant 0 : index
    %0 = vector.load %arg2[%c0, %c0_0, %c0_1] : memref<1x16x4xf32, #tpu.memory_space<vmem>>, vector<1x16x4xf32>
    %1 = vector.shape_cast %0 : vector<1x16x4xf32> to vector<16x4xf32>
    %c0_2 = arith.constant 0 : index
    %c0_3 = arith.constant 0 : index
    %c0_4 = arith.constant 0 : index
    %2 = vector.load %arg3[%c0_2, %c0_3, %c0_4] : memref<1x4x16xf32, #tpu.memory_space<vmem>>, vector<1x4x16xf32>
    %3 = vector.shape_cast %2 : vector<1x4x16xf32> to vector<4x16xf32>
    %c0_5 = arith.constant 0 : index
    %c0_6 = arith.constant 0 : index
    %c0_7 = arith.constant 0 : index
    %4 = vector.load %arg4[%c0_5, %c0_6, %c0_7] : memref<1x8x4xf32, #tpu.memory_space<vmem>>, vector<1x8x4xf32>
    %5 = vector.shape_cast %4 : vector<1x8x4xf32> to vector<8x4xf32>
    %6 = arith.mulf %3, %3 : vector<4x16xf32>
    %cst = arith.constant dense<0.000000e+00> : vector<16xf32>
    %7 = vector.multi_reduction <add>, %6, %cst [0] : vector<4x16xf32> to vector<16xf32>
    %8 = vector.shape_cast %7 : vector<16xf32> to vector<1x16xf32>
    %9 = arith.mulf %5, %5 : vector<8x4xf32>
    %cst_8 = arith.constant dense<0.000000e+00> : vector<8xf32>
    %10 = vector.multi_reduction <add>, %9, %cst_8 [1] : vector<8x4xf32> to vector<8xf32>
    %11 = vector.shape_cast %10 : vector<8xf32> to vector<8x1xf32>
    %12 = vector.broadcast %11 : vector<8x1xf32> to vector<8x16xf32>
    %13 = vector.broadcast %8 : vector<1x16xf32> to vector<8x16xf32>
    %14 = arith.addf %12, %13 : vector<8x16xf32>
    %cst_9 = arith.constant dense<0.000000e+00> : vector<8x16xf32>
    %15 = tpu.matmul %5, %3, %cst_9 {dimension_numbers = #tpu.dot_dimension_numbers<[1], [0], [0], [1], [0, 0, 1, 1], [], []>} : vector<8x4xf32>, vector<4x16xf32>, vector<8x16xf32> -> vector<8x16xf32>
    %cst_10 = arith.constant 2.000000e+00 : f32
    %16 = vector.broadcast %cst_10 : f32 to vector<8x16xf32>
    %17 = arith.mulf %16, %15 : vector<8x16xf32>
    %18 = arith.subf %14, %17 : vector<8x16xf32>
    %c0_11 = arith.constant 0 : index
    %c0_12 = arith.constant 0 : index
    %19 = vector.load %arg5[%c0_11, %c0_12] : memref<4x4xf32, #tpu.memory_space<vmem>>, vector<4x4xf32>
    %cst_13 = arith.constant dense<0.000000e+00> : vector<8x4xf32>
    %20 = tpu.matmul %5, %19, %cst_13 {dimension_numbers = #tpu.dot_dimension_numbers<[1], [0], [0], [1], [0, 0, 1, 1], [], []>} : vector<8x4xf32>, vector<4x4xf32>, vector<8x4xf32> -> vector<8x4xf32>
    %c0_14 = arith.constant 0 : index
    %c0_15 = arith.constant 0 : index
    %21 = vector.load %arg7[%c0_14, %c0_15] : memref<1x4xf32, #tpu.memory_space<vmem>>, vector<1x4xf32>
    %22 = vector.broadcast %21 : vector<1x4xf32> to vector<8x4xf32>
    %23 = arith.addf %20, %22 : vector<8x4xf32>
    %c0_16 = arith.constant 0 : index
    %c0_17 = arith.constant 0 : index
    %24 = vector.load %arg6[%c0_16, %c0_17] : memref<4x4xf32, #tpu.memory_space<vmem>>, vector<4x4xf32>
    %cst_18 = arith.constant dense<0.000000e+00> : vector<16x4xf32>
    %25 = tpu.matmul %1, %24, %cst_18 {dimension_numbers = #tpu.dot_dimension_numbers<[1], [0], [0], [1], [0, 0, 1, 1], [], []>} : vector<16x4xf32>, vector<4x4xf32>, vector<16x4xf32> -> vector<16x4xf32>
    %26 = tpu.iota {dimensions = array<i32: 1>} : vector<8x16xi32>
    %cst_19 = arith.constant 0.000000e+00 : f32
    %27 = vector.broadcast %cst_19 : f32 to vector<8x16xf32>
    %28 = arith.maximumf %18, %27 : vector<8x16xf32>
    %cst_20 = arith.constant 1.000000e+00 : f32
    %29 = vector.broadcast %cst_20 : f32 to vector<8x16xf32>
    %30 = arith.addf %28, %29 : vector<8x16xf32>
    %31 = tpu.bitcast %30 : vector<8x16xf32> -> vector<8x16xi32>
    %c-16_i32 = arith.constant -16 : i32
    %32 = vector.broadcast %c-16_i32 : i32 to vector<8x16xi32>
    %33 = arith.andi %31, %32 : vector<8x16xi32>
    %34 = arith.ori %33, %26 : vector<8x16xi32>
    %35 = tpu.bitcast %34 : vector<8x16xi32> -> vector<8x16xf32>
    %c0_i32 = arith.constant 0 : i32
    %cst_21 = arith.constant dense<0x7F800000> : vector<8xf32>
    %36 = vector.multi_reduction <minimumf>, %35, %cst_21 [1] : vector<8x16xf32> to vector<8xf32>
    %37 = vector.shape_cast %36 : vector<8xf32> to vector<8x1xf32>
    %38 = vector.broadcast %37 : vector<8x1xf32> to vector<8x16xf32>
    %39 = arith.cmpf oeq, %35, %38 : vector<8x16xf32>
    %40 = arith.extui %39 : vector<8x16xi1> to vector<8x16xi32>
    %41 = arith.sitofp %40 : vector<8x16xi32> to vector<8x16xf32>
    %cst_22 = arith.constant dense<0.000000e+00> : vector<8x4xf32>
    %42 = tpu.matmul %41, %25, %cst_22 {dimension_numbers = #tpu.dot_dimension_numbers<[1], [0], [0], [1], [0, 0, 1, 1], [], []>} : vector<8x16xf32>, vector<16x4xf32>, vector<8x4xf32> -> vector<8x4xf32>
    %43 = arith.index_cast %c0_i32 : i32 to index
    %c0_23 = arith.constant 0 : index
    %c0_24 = arith.constant 0 : index
    %44 = vector.load %arg11[%43, %c0_23, %c0_24] : memref<4x8x4xf32, #tpu.memory_space<vmem>>, vector<1x8x4xf32>
    %45 = vector.shape_cast %44 : vector<1x8x4xf32> to vector<8x4xf32>
    %46 = vector.shape_cast %42 : vector<8x4xf32> to vector<1x8x4xf32>
    tpu.vector_store %arg11[%43, %c0_23, %c0_24], %46 {strides = array<i32>} : memref<4x8x4xf32, #tpu.memory_space<vmem>>, vector<1x8x4xf32>,
    %cst_25 = arith.constant 0x7F800000 : f32
    %47 = vector.broadcast %cst_25 : f32 to vector<8x16xf32>
    %48 = arith.select %39, %47, %35 : vector<8x16xi1>, vector<8x16xf32>
    %c1_i32 = arith.constant 1 : i32
    %cst_26 = arith.constant dense<0x7F800000> : vector<8xf32>
    %49 = vector.multi_reduction <minimumf>, %48, %cst_26 [1] : vector<8x16xf32> to vector<8xf32>
    %50 = vector.shape_cast %49 : vector<8xf32> to vector<8x1xf32>
    %51 = vector.broadcast %50 : vector<8x1xf32> to vector<8x16xf32>
    %52 = arith.cmpf oeq, %48, %51 : vector<8x16xf32>
    %53 = arith.extui %52 : vector<8x16xi1> to vector<8x16xi32>
    %54 = arith.sitofp %53 : vector<8x16xi32> to vector<8x16xf32>
    %cst_27 = arith.constant dense<0.000000e+00> : vector<8x4xf32>
    %55 = tpu.matmul %54, %25, %cst_27 {dimension_numbers = #tpu.dot_dimension_numbers<[1], [0], [0], [1], [0, 0, 1, 1], [], []>} : vector<8x16xf32>, vector<16x4xf32>, vector<8x4xf32> -> vector<8x4xf32>
    %56 = arith.index_cast %c1_i32 : i32 to index
    %c0_28 = arith.constant 0 : index
    %c0_29 = arith.constant 0 : index
    %57 = vector.load %arg11[%56, %c0_28, %c0_29] : memref<4x8x4xf32, #tpu.memory_space<vmem>>, vector<1x8x4xf32>
    %58 = vector.shape_cast %57 : vector<1x8x4xf32> to vector<8x4xf32>
    %59 = vector.shape_cast %55 : vector<8x4xf32> to vector<1x8x4xf32>
    tpu.vector_store %arg11[%56, %c0_28, %c0_29], %59 {strides = array<i32>} : memref<4x8x4xf32, #tpu.memory_space<vmem>>, vector<1x8x4xf32>,
    %cst_30 = arith.constant 0x7F800000 : f32
    %60 = vector.broadcast %cst_30 : f32 to vector<8x16xf32>
    %61 = arith.select %52, %60, %48 : vector<8x16xi1>, vector<8x16xf32>
    %c2_i32 = arith.constant 2 : i32
    %cst_31 = arith.constant dense<0x7F800000> : vector<8xf32>
    %62 = vector.multi_reduction <minimumf>, %61, %cst_31 [1] : vector<8x16xf32> to vector<8xf32>
    %63 = vector.shape_cast %62 : vector<8xf32> to vector<8x1xf32>
    %64 = vector.broadcast %63 : vector<8x1xf32> to vector<8x16xf32>
    %65 = arith.cmpf oeq, %61, %64 : vector<8x16xf32>
    %66 = arith.extui %65 : vector<8x16xi1> to vector<8x16xi32>
    %67 = arith.sitofp %66 : vector<8x16xi32> to vector<8x16xf32>
    %cst_32 = arith.constant dense<0.000000e+00> : vector<8x4xf32>
    %68 = tpu.matmul %67, %25, %cst_32 {dimension_numbers = #tpu.dot_dimension_numbers<[1], [0], [0], [1], [0, 0, 1, 1], [], []>} : vector<8x16xf32>, vector<16x4xf32>, vector<8x4xf32> -> vector<8x4xf32>
    %69 = arith.index_cast %c2_i32 : i32 to index
    %c0_33 = arith.constant 0 : index
    %c0_34 = arith.constant 0 : index
    %70 = vector.load %arg11[%69, %c0_33, %c0_34] : memref<4x8x4xf32, #tpu.memory_space<vmem>>, vector<1x8x4xf32>
    %71 = vector.shape_cast %70 : vector<1x8x4xf32> to vector<8x4xf32>
    %72 = vector.shape_cast %68 : vector<8x4xf32> to vector<1x8x4xf32>
    tpu.vector_store %arg11[%69, %c0_33, %c0_34], %72 {strides = array<i32>} : memref<4x8x4xf32, #tpu.memory_space<vmem>>, vector<1x8x4xf32>,
    %cst_35 = arith.constant 0x7F800000 : f32
    %73 = vector.broadcast %cst_35 : f32 to vector<8x16xf32>
    %74 = arith.select %65, %73, %61 : vector<8x16xi1>, vector<8x16xf32>
    %c3_i32 = arith.constant 3 : i32
    %cst_36 = arith.constant dense<0x7F800000> : vector<8xf32>
    %75 = vector.multi_reduction <minimumf>, %74, %cst_36 [1] : vector<8x16xf32> to vector<8xf32>
    %76 = vector.shape_cast %75 : vector<8xf32> to vector<8x1xf32>
    %77 = vector.broadcast %76 : vector<8x1xf32> to vector<8x16xf32>
    %78 = arith.cmpf oeq, %74, %77 : vector<8x16xf32>
    %79 = arith.extui %78 : vector<8x16xi1> to vector<8x16xi32>
    %80 = arith.sitofp %79 : vector<8x16xi32> to vector<8x16xf32>
    %cst_37 = arith.constant dense<0.000000e+00> : vector<8x4xf32>
    %81 = tpu.matmul %80, %25, %cst_37 {dimension_numbers = #tpu.dot_dimension_numbers<[1], [0], [0], [1], [0, 0, 1, 1], [], []>} : vector<8x16xf32>, vector<16x4xf32>, vector<8x4xf32> -> vector<8x4xf32>
    %82 = arith.index_cast %c3_i32 : i32 to index
    %c0_38 = arith.constant 0 : index
    %c0_39 = arith.constant 0 : index
    %83 = vector.load %arg11[%82, %c0_38, %c0_39] : memref<4x8x4xf32, #tpu.memory_space<vmem>>, vector<1x8x4xf32>
    %84 = vector.shape_cast %83 : vector<1x8x4xf32> to vector<8x4xf32>
    %85 = vector.shape_cast %81 : vector<8x4xf32> to vector<1x8x4xf32>
    tpu.vector_store %arg11[%82, %c0_38, %c0_39], %85 {strides = array<i32>} : memref<4x8x4xf32, #tpu.memory_space<vmem>>, vector<1x8x4xf32>,
    %cst_40 = arith.constant 0x7F800000 : f32
    %86 = vector.broadcast %cst_40 : f32 to vector<8x16xf32>
    %87 = arith.select %78, %86, %74 : vector<8x16xi1>, vector<8x16xf32>
    %c4_i32 = arith.constant 4 : i32
    %c0_41 = arith.constant 0 : index
    %c0_42 = arith.constant 0 : index
    %c0_43 = arith.constant 0 : index
    %88 = vector.load %arg11[%c0_41, %c0_42, %c0_43] : memref<4x8x4xf32, #tpu.memory_space<vmem>>, vector<4x8x4xf32>
    %89 = vector.shape_cast %23 : vector<8x4xf32> to vector<1x8x4xf32>
    %90 = vector.broadcast %89 : vector<1x8x4xf32> to vector<4x8x4xf32>
    %91 = arith.addf %88, %90 : vector<4x8x4xf32>
    %cst_44 = arith.constant 0.000000e+00 : f32
    %92 = vector.broadcast %cst_44 : f32 to vector<4x8x4xf32>
    %93 = arith.maximumf %91, %92 : vector<4x8x4xf32>
    %94 = vector.shape_cast %93 : vector<4x8x4xf32> to vector<32x4xf32>
    %c0_45 = arith.constant 0 : index
    %c0_46 = arith.constant 0 : index
    %95 = vector.load %arg8[%c0_45, %c0_46] : memref<4x8xf32, #tpu.memory_space<vmem>>, vector<4x8xf32>
    %cst_47 = arith.constant dense<0.000000e+00> : vector<32x8xf32>
    %96 = tpu.matmul %94, %95, %cst_47 {dimension_numbers = #tpu.dot_dimension_numbers<[1], [0], [0], [1], [0, 0, 1, 1], [], []>} : vector<32x4xf32>, vector<4x8xf32>, vector<32x8xf32> -> vector<32x8xf32>
    %97 = vector.shape_cast %96 : vector<32x8xf32> to vector<4x8x8xf32>
    %c0_48 = arith.constant 0 : index
    %c0_49 = arith.constant 0 : index
    %98 = vector.load %arg9[%c0_48, %c0_49] : memref<1x8xf32, #tpu.memory_space<vmem>>, vector<1x8xf32>
    %99 = vector.shape_cast %98 : vector<1x8xf32> to vector<1x1x8xf32>
    %100 = vector.broadcast %99 : vector<1x1x8xf32> to vector<4x8x8xf32>
    %101 = arith.addf %97, %100 : vector<4x8x8xf32>
    %cst_50 = arith.constant dense<0xFF800000> : vector<8x8xf32>
    %102 = vector.multi_reduction <maximumf>, %101, %cst_50 [0] : vector<4x8x8xf32> to vector<8x8xf32>
    %c0_51 = arith.constant 0 : index
    %c0_52 = arith.constant 0 : index
    %c0_53 = arith.constant 0 : index
    %103 = vector.load %arg10[%c0_51, %c0_52, %c0_53] : memref<1x8x8xf32, #tpu.memory_space<vmem>>, vector<1x8x8xf32>
    %104 = vector.shape_cast %103 : vector<1x8x8xf32> to vector<8x8xf32>
    %105 = vector.shape_cast %102 : vector<8x8xf32> to vector<1x8x8xf32>
    tpu.vector_store %arg10[%c0_51, %c0_52, %c0_53], %105 {strides = array<i32>} : memref<1x8x8xf32, #tpu.memory_space<vmem>>, vector<1x8x8xf32>,
    return
  }
  func.func @transform_0(%arg0: i32, %arg1: i32) -> (i32, i32, i32) {
    %c0_i32 = arith.constant 0 : i32
    %c0_i32_0 = arith.constant 0 : i32
    %c0_i32_1 = arith.constant 0 : i32
    return %arg0, %c0_i32, %c0_i32_0 : i32, i32, i32
  }
  func.func @transform_1(%arg0: i32, %arg1: i32) -> (i32, i32, i32) {
    %c0_i32 = arith.constant 0 : i32
    %c0_i32_0 = arith.constant 0 : i32
    %c0_i32_1 = arith.constant 0 : i32
    return %arg0, %c0_i32, %c0_i32_0 : i32, i32, i32
  }
  func.func @transform_2(%arg0: i32, %arg1: i32) -> (i32, i32, i32) {
    %c0_i32 = arith.constant 0 : i32
    %c0_i32_0 = arith.constant 0 : i32
    return %arg0, %arg1, %c0_i32 : i32, i32, i32
  }
  func.func @transform_3(%arg0: i32, %arg1: i32) -> (i32, i32) {
    %c0_i32 = arith.constant 0 : i32
    %c0_i32_0 = arith.constant 0 : i32
    %c0_i32_1 = arith.constant 0 : i32
    return %c0_i32, %c0_i32_0 : i32, i32
  }
  func.func @transform_4(%arg0: i32, %arg1: i32) -> (i32, i32) {
    %c0_i32 = arith.constant 0 : i32
    %c0_i32_0 = arith.constant 0 : i32
    %c0_i32_1 = arith.constant 0 : i32
    return %c0_i32, %c0_i32_0 : i32, i32
  }
  func.func @transform_5(%arg0: i32, %arg1: i32) -> (i32, i32) {
    %c0_i32 = arith.constant 0 : i32
    %c0_i32_0 = arith.constant 0 : i32
    %c0_i32_1 = arith.constant 0 : i32
    return %c0_i32, %c0_i32_0 : i32, i32
  }
  func.func @transform_6(%arg0: i32, %arg1: i32) -> (i32, i32) {
    %c0_i32 = arith.constant 0 : i32
    %c0_i32_0 = arith.constant 0 : i32
    %c0_i32_1 = arith.constant 0 : i32
    return %c0_i32, %c0_i32_0 : i32, i32
  }
  func.func @transform_7(%arg0: i32, %arg1: i32) -> (i32, i32) {
    %c0_i32 = arith.constant 0 : i32
    %c0_i32_0 = arith.constant 0 : i32
    %c0_i32_1 = arith.constant 0 : i32
    return %c0_i32, %c0_i32_0 : i32, i32
  }
  func.func @transform_8(%arg0: i32, %arg1: i32) -> (i32, i32, i32) {
    %c0_i32 = arith.constant 0 : i32
    %c0_i32_0 = arith.constant 0 : i32
    return %arg0, %arg1, %c0_i32 : i32, i32, i32
  }
}

</mosaic_0001>

<bundles_post_ra>
// kernel: tpu_custom_call.1
= control target key start
LH: loop header
LB: loop body
LE: loop exit
PB: predicated region body
PF: predicated region fallthrough
CT: control target
= control target key end

     0   :  { %s1471_s27 = smov 0   ;;  %s1473_s28 = smov 0   ;;  %s1600_s0 = inlined_call_operand.vmem [shape: f32[2,16,4], index: 0, kind: input, shape index: {}]   ;;  %s1601_s1 = inlined_call_operand.vmem [shape: f32[2,4,16], index: 1, kind: input, shape index: {}]   ;;  %s1602_s2 = inlined_call_operand.vmem [shape: f32[2,16,4], index: 2, kind: input, shape index: {}]   ;;  %s1603_s3 = inlined_call_operand.vmem [shape: f32[4,4], index: 3, kind: input, shape index: {}]   ;;  %s1604_s4 = inlined_call_operand.vmem [shape: f32[4,4], index: 4, kind: input, shape index: {}]   ;;  %s1605_s5 = inlined_call_operand.vmem [shape: f32[1,4], index: 5, kind: input, shape index: {}]   ;;  %s1606_s6 = inlined_call_operand.vmem [shape: f32[4,8], index: 6, kind: input, shape index: {}]   ;;  %s1607_s7 = inlined_call_operand.vmem [shape: f32[1,8], index: 7, kind: input, shape index: {}]   ;;  %s1608_s8 = inlined_call_operand.vmem [shape: f32[2,16,8], index: 8, kind: output, shape index: {}]  }
   0x1   :  { %s1475_s29 = smov 0   ;;  %s1477_s30 = smov 0  }
   0x2   :  { %s1479_s9 = smov 0  }
   0x3 LB: > { %s27_s10 = sadd.s32 1, %s1413_s29  ;;  %s30_s11 = sadd.s32 1, %s1417_s30  ;;  %s1421_s9 = sphi %s1479_s9, %s18_s9   ;;  %s1417_s30 = sphi %s1477_s30, %s1612_s30   ;;  %s1413_s29 = sphi %s1475_s29, %s1611_s29   ;;  %s1409_s28 = sphi %s1473_s28, %s1610_s28   ;;  %s1405_s27 = sphi %s1471_s27, %s1609_s27  }
   0x4   : > { %p28_p0 = scmp.ge.s32.totalorder %s27_s10, 2  ;;  %p1220_p1 = scmp.ge.s32.totalorder %s1421_s9, 1 }
   0x5   : > { %p300_p2 = scmp.lt.s32.totalorder %s1421_s9, 5 }
   0x6   : > { %s1614_s10 = smov (%p28_p0, %s27_s10), 0  ;;  %s1616_s11 = smov (!%p28_p0, %s30_s11), %s1417_s30 }
   0x7   : > { %p301_p3 = pnand %p1220_p1, %p300_p2  ;;  %p32_p4 = scmp.ge.s32.totalorder %s1616_s11, 2 }
   0x8   : > { %p349_p5 = scmp.lt.s32.totalorder (!%p301_p3), %s1409_s28, 1  ;;  %p360_p6 = scmp.lt.s32.totalorder (!%p301_p3), %s1405_s27, 1  ;;  %v1423_v0 = vmov (!%p301_p3), 0.0   ;;  %vm1424_vm0 = vmmov (!%p301_p3), 0   ;;  %vm396_vm1 = vcmask (!%p301_p3), 1043456   ;;  %vm388_vm2 = vcmask (!%p301_p3), 31744  }
   0x9   : > { %s1618_s11 = smov (%p32_p4, %s1616_s11), 0  ;;  %304 = sbr.rel (%p301_p3) target bundleno = 1271 (0x4f7), region = 52 }
   0xa   : > { %1277 = vmatprep.subr.mxu0 (!%p301_p3), %v1423_v0  ;;  %1279 = vmatprep.mubr.msk.f32.mxu0 (!%p301_p3), %vm1424_vm0, %v1423_v0  ;;  %v553_v1 = vld [vmem:[%s1604_s4] sm:$0xf] (!%p301_p3)  ;;  %v1425_v9 = vmov (!%p301_p3), 0.0|0.0   ;;  %vm379_vm3 = vcmask (!%p301_p3), 125952   ;;  %v638_v24 = vlaneseq (!%p301_p3)  ;;  %vm646_vm4 = vcmask (!%p301_p3), 130048  }
   0xb   : > { %1282 = vmatprep.subr.mxu1 (!%p301_p3), %v1423_v0  ;;  %1284 = vmatprep.mubr.msk.f32.mxu1 (!%p301_p3), %vm1424_vm0, %v1423_v0  ;;  %v472_v8 = vld [vmem:[%s1603_s3] sm:$0xf] (!%p301_p3)  ;;  %vm1097_vm9 = vcmask (!%p301_p3), 64512  }
   0xc   : > { %1283 = vmatpush3.msk.msra.mxu1 (!%p301_p3), %vm396_vm1, %v472_v8  ;;  %v639_v30 = vand.u32 (!%p301_p3), 127, %v638_v24  ;;  %v985_v46 = vld [vmem:[%s1606_s6] sm:$0xf] (!%p301_p3) }
   0xd   : > { %1328 = vmatprep.subr.bf16.mxu1 (!%p301_p3), %v1425_v9  ;;  %v1230_v47 = vld [vmem:[%s1605_s5] ss:$0 sm:$0xff] (!%p301_p3) }
  0x10   : > { %s1620_s28 = smov (!%p349_p5, %s1409_s28), 1  ;;  %s1622_s27 = smov (!%p360_p6, %s1405_s27), 1 }
  0x11   : > { %s1223_s12 = sshll.u32 %s1620_s28, 2  ;;  %s1224_s13 = sshll.u32 %s1620_s28, 1 }
  0x12   : > { %s357_s16 = scalar_lea.vmem %s1601_s1, %s1223_s12  ;;  %s1510_s17 = sadd.s32 %s1224_s13, %s1622_s27 }
  0x13   : > { %v376_v2 = vld [vmem:[%s357_s16] sm:$0xf]  ;;  %s1225_s20 = sshll.u32 %s1510_s17, 3  ;;  %s1252_s21 = sshll.u32 %s1620_s28, 4 }
  0x14   : > { %1278 = vmatpush3.msk.msra.mxu0 %vm396_vm1, %v376_v2  ;;  %s365_s24 = scalar_lea.vmem %s1602_s2, %s1225_s20  ;;  %s353_s27 = scalar_lea.vmem %s1600_s0, %s1252_s21  ;;  %v378_v10 = vmul.f32 %v376_v2, %v376_v2 }
  0x15   : > { %v377_v3 = vld [vmem:[%s365_s24] sm:$0xff]  ;;  %1287 = vmatprep.subr.msk.mxu0 %vm396_vm1, %v553_v1  ;;  %v375_v6 = vld [vmem:[%s353_s27 + $0x8] sm:$0xff]  ;;  %s373_s23 = scalar_lea.vmem %s1608_s8, %s1225_s20 }
  0x16   : > { %1280 = vmatmul.mubr.msk.f32.vlgmr.msra.gmra.mrb[0].mxu0 %vm388_vm2, %v377_v3  ;;  %v387_v4 = vmul.f32 %v377_v3, %v377_v3  ;;  %v374_v5 = vld [vmem:[%s353_s27] sm:$0xff]  ;;  %1285 = vmatmul.mubr.msk.f32.vlgmr.msra.gmra.mrb[0].mxu1 %vm388_vm2, %v377_v3  ;;  %v380_v11 = vsel %vm379_vm3, %v378_v10, 0.0 }
  0x17   : > { %1288 = vmatpush3.msk.msra.mxu0 %vm396_vm1, %v553_v1  ;;  %1289 = vmatprep.mubr.msk.f32.mxu0 %vm388_vm2, %v374_v5  ;;  %v381_v12 = vrot.slane %v380_v11, 4  ;;  %v1249_v5 = vld [vmem:[%s1607_s7] ss:$0 sm:$0xff] }
  0x18   : > { %v389_v7 = vsel %vm388_vm2, %v387_v4, 0.0  ;;  %1331 = vmatprep.subr.bf16.mxu0 %v1425_v9  ;;  %1296 = vmatprep.mubr.msk.f32.mxu1 %vm1424_vm0, %v1423_v0 }
  0x19   : > { %390 = vadd.xlane.f32.xlu0 %v389_v7  ;;  %v382_v13 = vadd.f32 %v381_v12, %v380_v11 }
  0x1a   : > { %1290 = vmatmul.mubr.msk.f32.vlgmr.msra.gmra.mrb[2].mxu0 %vm388_vm2, %v375_v6 }
  0x1b   : > { %1303 = vmatprep.mubr.msk.f32.mxu0 %vm1424_vm0, %v1423_v0  ;;  %v383_v14 = vrot.slane %v382_v13, 2 }
  0x1d   : > { %v384_v15 = vadd.f32 %v383_v14, %v382_v13 }
  0x1f   : > { %v385_v16 = vrot.slane %v384_v15, 1 }
  0x21   : > { %v386_v17 = vadd.f32 %v385_v16, %v384_v15 }
  0xa6   : > { %v391_v18 = vpop.xlane.xlu0 %390 }
  0xa7   : > { %v392_v19 = vadd.f32 %v391_v18, %v386_v17 }
  0xe9   : > { %v466_v20 = vpop.f32.mrb[0].mxu0  ;;  %v549_v38 = vpop.f32.mrb[0].mxu1 }
  0xea   : > { %v470_v21 = vmul.f32 2.0, %v466_v20  ;;  %v1281_v22 = vpop.f32.mrb[1].mxu0  ;;  %v1286_v39 = vpop.f32.mrb[1].mxu1  ;;  %v550_v48 = vadd.f32 %v1230_v47, %v549_v38 }
  0xec   : > { %v471_v23 = vsub.f32 %v392_v19, %v470_v21 }
  0xed   : > { %v1291_v25 = vpop.f32.mrb[2].mxu0 }
  0xee   : > { %v640_v26 = vmax.f32 %v471_v23, 0.0  ;;  %v629_v27 = vpop.f32.mrb[3].mxu0 }
  0xef   : > { %v1329_v28 = vpack.c.bf16 %v1291_v25, %v629_v27 }
  0xf0   : > { %v641_v29 = vadd.f32 1.0, %v640_v26 }
  0xf1   : > { %1330 = vmatpush3.bf16.msra.mxu1 %v1329_v28  ;;  %1333 = vmatpush3.bf16.msra.mxu0 %v1329_v28 }
  0xf2   : > { %v643_v31 = vand.u32 4294967280, %v641_v29  ;;  %1334 = vmatprep.subr.bf16.mxu1 %v1425_v9  ;;  %1337 = vmatprep.subr.bf16.mxu0 %v1425_v9 }
  0xf4   : > { %v644_v32 = vor.u32 %v643_v31, %v639_v30 }
  0xf6   : > { %v647_v33 = vsel %vm646_vm4, %v644_v32, inf }
  0xf7   : > { %648 = vmin.xlane.f32.xlu0 %v647_v33 }
 0x184   : > { %v649_v34 = vpop.xlane.xlu0 %648 }
 0x185   : > { %vm650_vm5 = vcmp.eq.f32.partialorder %v644_v32, %v649_v34 }
 0x186   : > { %v1236_v35 = vsel %vm650_vm5, 1.0, %v1423_v0  ;;  %v727_v36 = vsel %vm650_vm5, inf, %v644_v32 }
 0x187   : > { %1297 = vmatmul.mubr.msk.f32.vlgmr.msra.gmra.mrb[2].mxu1 %vm646_vm4, %v1236_v35  ;;  %v728_v37 = vsel %vm646_vm4, %v727_v36, inf }
 0x188   : > { %729 = vmin.xlane.f32.xlu1 %v728_v37  ;;  %1336 = vmatpush3.bf16.msra.mxu1 %v1329_v28 }
 0x189   : > { %1310 = vmatprep.mubr.msk.f32.mxu1 %vm1424_vm0, %v1423_v0  ;;  %1320 = vmatprep.subr.msk.mxu1 %vm396_vm1, %v985_v46 }
 0x215   : > { %v730_v40 = vpop.xlane.xlu1 %729 }
 0x216   : > { %vm731_vm6 = vcmp.eq.f32.partialorder %v727_v36, %v730_v40 }
 0x217   : > { %v1238_v41 = vsel %vm731_vm6, 1.0, %v1423_v0  ;;  %v809_v42 = vsel %vm731_vm6, inf, %v727_v36 }
 0x218   : > { %1304 = vmatmul.mubr.msk.f32.vlgmr.msra.gmra.mrb[4].mxu0 %vm646_vm4, %v1238_v41  ;;  %v810_v43 = vsel %vm646_vm4, %v809_v42, inf }
 0x219   : > { %811 = vmin.xlane.f32.xlu1 %v810_v43  ;;  %1339 = vmatpush3.bf16.msra.mxu0 %v1329_v28 }
 0x21a   : > { %1317 = vmatprep.mubr.msk.f32.mxu0 %vm1424_vm0, %v1423_v0 }
 0x25a   : > { %v722_v44 = vpop.f32.mrb[2].mxu1 }
 0x25b   : > { %726 = vst.msk [vmem:[#allocation2] sm:$0xff] %vm388_vm2, %v722_v44  ;;  %v1298_v45 = vpop.f32.mrb[3].mxu1 }
 0x262   : > { %v973_v49 = vld [vmem:[#allocation2] sm:$0xff] }
 0x263   : > { %v977_v50 = vadd.f32 %v973_v49, %v550_v48 }
 0x265   : > { %v981_v54 = vmax.f32 %v977_v50, 0.0 }
 0x2a6   : > { %v812_v51 = vpop.xlane.xlu1 %811 }
 0x2a7   : > { %vm813_vm7 = vcmp.eq.f32.partialorder %v809_v42, %v812_v51 }
 0x2a8   : > { %v1240_v52 = vsel %vm813_vm7, 1.0, %v1423_v0  ;;  %v891_v53 = vsel %vm813_vm7, inf, %v809_v42 }
 0x2a9   : > { %1311 = vmatmul.mubr.msk.f32.vlgmr.msra.gmra.mrb[4].mxu1 %vm646_vm4, %v1240_v52  ;;  %v892_v55 = vsel %vm646_vm4, %v891_v53, inf }
 0x2aa   : > { %893 = vmin.xlane.f32.xlu0 %v892_v55  ;;  %1322 = vmatprep.mubr.msk.f32.mxu1 %vm388_vm2, %v981_v54 }
 0x2ab   : > { %1321 = vmatpush3.msk.msra.mxu1 %vm396_vm1, %v985_v46 }
 0x2eb   : > { %v803_v56 = vpop.f32.mrb[4].mxu0 }
 0x2ec   : > { %808 = vst.msk [vmem:[#allocation2 + $0x8] sm:$0xff] %vm388_vm2, %v803_v56  ;;  %v1305_v57 = vpop.f32.mrb[5].mxu0 }
 0x2f3   : > { %v974_v58 = vld [vmem:[#allocation2 + $0x8] sm:$0xff] }
 0x2f4   : > { %v978_v59 = vadd.f32 %v974_v58, %v550_v48 }
 0x2f6   : > { %v982_v60 = vmax.f32 %v978_v59, 0.0 }
 0x2f8   : > { %1323 = vmatmul.mubr.msk.f32.vlgmr.msra.gmra.mrb[6].mxu1 %vm388_vm2, %v982_v60 }
 0x337   : > { %v894_v61 = vpop.xlane.xlu0 %893 }
 0x338   : > { %vm895_vm8 = vcmp.eq.f32.partialorder %v891_v53, %v894_v61 }
 0x339   : > { %v1242_v62 = vsel %vm895_vm8, 1.0, %v1423_v0 }
 0x33a   : > { %1318 = vmatmul.mubr.msk.f32.vlgmr.msra.gmra.mrb[6].mxu0 %vm646_vm4, %v1242_v62 }
 0x37c   : > { %v885_v63 = vpop.f32.mrb[4].mxu1 }
 0x37d   : > { %890 = vst.msk [vmem:[#allocation2 + $0x10] sm:$0xff] %vm388_vm2, %v885_v63  ;;  %v1312_v1 = vpop.f32.mrb[5].mxu1 }
 0x384   : > { %v975_v2 = vld [vmem:[#allocation2 + $0x10] sm:$0xff] }
 0x385   : > { %v979_v3 = vadd.f32 %v975_v2, %v550_v48 }
 0x387   : > { %v983_v4 = vmax.f32 %v979_v3, 0.0 }
 0x389   : > { %1325 = vmatprep.mubr.msk.f32.mxu1 %vm388_vm2, %v983_v4 }
 0x3cb   : > { %v1324_v6 = vpop.f32.mrb[6].mxu1 }
 0x3cc   : > { %v1094_v7 = vadd.f32 %v1324_v6, %v1249_v5  ;;  %v1067_v8 = vpop.f32.mrb[7].mxu1 }
 0x3cd   : > { %v1093_v0 = vadd.f32 %v1249_v5, %v1067_v8 }
 0x3ce   : > { %v1099_v9 = vsel %vm1097_vm9, %v1094_v7, -inf }
 0x3cf   : > { %v1098_v10 = vsel %vm1097_vm9, %v1093_v0, -inf }
 0x3d0   : > { %v1102_v11 = vmax.f32 %v1098_v10, %v1099_v9 }
 0x40d   : > { %v967_v12 = vpop.f32.mrb[6].mxu0 }
 0x40e   : > { %972 = vst.msk [vmem:[#allocation2 + $0x18] sm:$0xff] %vm388_vm2, %v967_v12  ;;  %v1319_v13 = vpop.f32.mrb[7].mxu0 }
 0x415   : > { %v976_v14 = vld [vmem:[#allocation2 + $0x18] sm:$0xff] }
 0x416   : > { %v980_v15 = vadd.f32 %v976_v14, %v550_v48 }
 0x418   : > { %v984_v16 = vmax.f32 %v980_v15, 0.0 }
 0x41a   : > { %1326 = vmatmul.mubr.msk.f32.gmra.mrb[8].mxu1 %vm388_vm2, %v984_v16 }
 0x4ed   : > { %v1327_v17 = vpop.f32.mrb[8].mxu1 }
 0x4ee   : > { %v1096_v18 = vadd.f32 %v1327_v17, %v1249_v5  ;;  %v1077_v19 = vpop.f32.mrb[9].mxu1 }
 0x4ef   : > { %v1095_v20 = vadd.f32 %v1249_v5, %v1077_v19 }
 0x4f0   : > { %v1101_v21 = vsel %vm1097_vm9, %v1096_v18, -inf }
 0x4f1   : > { %v1100_v22 = vsel %vm1097_vm9, %v1095_v20, -inf }
 0x4f2   : > { %v1103_v23 = vmax.f32 %v1100_v22, %v1101_v21 }
 0x4f4   : > { %v1104_v24 = vmax.f32 %v1102_v11, %v1103_v23 }
 0x4f6   : > { %1105 = vst.msk [vmem:[%s373_s23] sm:$0xff] %vm1097_vm9, %v1104_v24 }
 0x4f7 PF: > { %s18_s9 = sadd.s32 1, %s1421_s9   ;;  %s1609_s27 = smov %s1413_s29 }
 0x4f8   : > { %p15_p7 = scmp.ge.s32.totalorder %s18_s9, 6   ;;  %s1610_s28 = smov %s1417_s30 }
 0x4f9   : > { %s1611_s29 = smov %s1614_s10  ;;  %s1612_s30 = smov %s1618_s11 }
 0x4fa   :  { %17 = sbr.rel (!%p15_p7) target bundleno = 3 (0x3), region = 91 }

</bundles_post_ra>
